<compile_context>
chip_gen: v7x
topology: tpu7x:2x2x1
jax: 0.10.0
libtpu: 0.0.40
codegen_flags: <defaults>
</compile_context>

<pallas_src>
import functools

import jax
import jax.numpy as jnp
import numpy as np
from jax import lax
from jax.experimental import pallas as pl
from jax.experimental.pallas import tpu as pltpu


def _round_up(n, m):
    return ((n + m - 1) // m) * m


# --------------------------------------------------------------------------- #
# Kernel
# --------------------------------------------------------------------------- #
def wide_deep_kernel(
    x_ref,                          # (TILE_B, D) f32   (pipelined over batch)
    w1_ref, b1_ref,                 # (D, d1) mm_dtype , (1, d1) f32   [BN folded]
    w2_ref, b2_ref,                 # (d1, d2)         , (1, d2)       [BN folded]
    w3_ref, b3_ref,                 # (d2, d3p)        , (1, d3p)      [BN folded + lane pad + bias lane]
    wide_mat_ref,                   # (8, D)   f32  row0 = wide.W * out.W[0], rows 1..7 zero
    deep_mat_ref,                   # (8, d3p) f32  row0 = deep_head.W * out.W[1] (+ folded bias lane)
    o_ref,                          # (1, 1, TILE_B) f32  (lane-dense output block)
    *, elementwise_bf16=False,
):
    x = x_ref[...]                                  # (TB, D) f32
    mm_dtype = w1_ref.dtype
    dn = (((1,), (1,)), ((), ()))                   # contract last dims (trans_b matmul)

    # Wide branch + output-Linear fold: (8, D) @ (TB, D)^T -> (8, TB) lane-dense,
    # row 0 is the real result (rows 1..7 are zero padding for sublane alignment).
    wide8 = lax.dot_general(wide_mat_ref[...], x, dn,
                            preferred_element_type=jnp.float32)          # (8, TB)

    # Deep branch: 3 x [Linear -> BatchNorm(eval, folded) -> ReLU -> Dropout(=id)].
    h = x.astype(mm_dtype)
    layers = ((w1_ref, b1_ref), (w2_ref, b2_ref), (w3_ref, b3_ref))
    for li, (w_ref, b_ref) in enumerate(layers):
        acc = jnp.dot(h, w_ref[...], preferred_element_type=jnp.float32)
        last = li == len(layers) - 1
        if elementwise_bf16 and not last:
            # v6e/v7x option: bf16 bias+ReLU packs 2 vals/lane and halves the
            # VMEM footprint of the intermediates. Keep f32 on v5e (default path).
            h = jnp.maximum(acc.astype(jnp.bfloat16)
                            + b_ref[...].astype(jnp.bfloat16), 0).astype(mm_dtype)
        else:
            a = jnp.maximum(acc + b_ref[...], 0.0)                       # f32
            h = a if last else a.astype(mm_dtype)

    # Deep head + folded output bias (reserved pad lane of layer 3 is 1.0 after
    # ReLU, deep_mat carries the total bias there): (8, d3p) @ (TB, d3p)^T.
    deep8 = lax.dot_general(deep_mat_ref[...], h, dn,
                            preferred_element_type=jnp.float32)          # (8, TB)

    # Lane-dense store: row 0 holds the real per-row outputs.
    o_ref[...] = (wide8[0:1, :] + deep8[0:1, :])[None]                   # (1, 1, TB)


# --------------------------------------------------------------------------- #
# Parameters (PyTorch-style raw params + offline folding for the kernel)
# --------------------------------------------------------------------------- #
def init_raw_params(key, input_dim, deep_dims=(256, 128, 64)):
    """Deterministic synthetic parameters matching WideDeepNN shapes.

    Weights are stored as (in_dim, out_dim) so y = x @ W + b (transpose of the
    PyTorch (out, in) layout — same math). BatchNorm uses non-trivial
    gamma/beta/running stats so the folding path is actually exercised.
    """
    keys = iter(jax.random.split(key, 6 * len(deep_dims) + 6))

    def lin(fan_in, fan_out):
        bound = 1.0 / np.sqrt(fan_in)
        w = jax.random.uniform(next(keys), (fan_in, fan_out), jnp.float32, -bound, bound)
        b = jax.random.uniform(next(keys), (fan_out,), jnp.float32, -bound, bound)
        return w, b

    wide_w, wide_b = lin(input_dim, 1)

    deep = []
    prev = input_dim
    for dim in deep_dims:
        w, b = lin(prev, dim)
        gamma = jax.random.uniform(next(keys), (dim,), jnp.float32, 0.5, 1.5)
        beta = 0.1 * jax.random.normal(next(keys), (dim,), jnp.float32)
        mean = 0.1 * jax.random.normal(next(keys), (dim,), jnp.float32)
        var = jax.random.uniform(next(keys), (dim,), jnp.float32, 0.5, 1.5)
        deep.append((w, b, gamma, beta, mean, var))
        prev = dim

    deep_out_w, deep_out_b = lin(prev, 1)
    out_w, out_b = lin(2, 1)
    out_w = out_w[:, 0]  # (2,)

    return dict(wide_w=wide_w, wide_b=wide_b, deep=tuple(deep),
                deep_out_w=deep_out_w, deep_out_b=deep_out_b,
                out_w=out_w, out_b=out_b)


def prepare_kernel_params(raw, *, use_bf16=True, eps=1e-5, lane_pad=128):
    """Fold BatchNorm + output Linear(2,1); pad layer 3 to lanes with a bias lane."""
    mm_dtype = jnp.bfloat16 if use_bf16 else jnp.float32

    folded = []
    for (w, b, gamma, beta, mean, var) in raw["deep"]:
        scale = gamma * lax.rsqrt(var + eps)                     # (dim,)
        shift = beta - mean * scale
        folded.append((w * scale[None, :], b * scale + shift))   # W' = W*s, b' = b*s + t
    (w1, b1), (w2, b2), (w3, b3) = folded

    # Zero-pad layer-3 width to a lane multiple, reserving >= 1 pad lane so the
    # scalar output bias can be folded in (ReLU(0*h + 1) == 1 for every row).
    d3 = w3.shape[1]
    d3p = _round_up(d3 + 1, lane_pad)
    pad = d3p - d3
    w3 = jnp.pad(w3, ((0, 0), (0, pad)))
    b3 = jnp.pad(b3, ((0, pad),)).at[d3].set(1.0)                # bias lane

    # Fold output Linear(2,1): out = wo0*wide + wo1*deep + total_bias.
    wo, bo = raw["out_w"], raw["out_b"]
    total_bias = raw["wide_b"][0] * wo[0] + raw["deep_out_b"][0] * wo[1] + bo[0]

    D = raw["wide_w"].shape[0]
    wide_mat = jnp.zeros((8, D), jnp.float32).at[0].set(raw["wide_w"][:, 0] * wo[0])
    deep_row = jnp.zeros((d3p,), jnp.float32)
    deep_row = deep_row.at[:d3].set(raw["deep_out_w"][:, 0] * wo[1])
    deep_row = deep_row.at[d3].set(total_bias)                   # folded output bias
    deep_mat = jnp.zeros((8, d3p), jnp.float32).at[0].set(deep_row)

    return dict(
        w1=w1.astype(mm_dtype), b1=b1[None, :].astype(jnp.float32),
        w2=w2.astype(mm_dtype), b2=b2[None, :].astype(jnp.float32),
        w3=w3.astype(mm_dtype), b3=b3[None, :].astype(jnp.float32),
        wide_mat=wide_mat, deep_mat=deep_mat,
    )


# --------------------------------------------------------------------------- #
# Wrapper
# --------------------------------------------------------------------------- #
def wide_deep_forward(x, kp, *, tile_b=None, elementwise_bf16=False,
                      vmem_limit_bytes=32 * 1024 * 1024):
    B, D = x.shape
    assert kp["w1"].shape[0] == D

    # Batch tile: large enough to amortize the ~0.35 us per-grid-step overhead,
    # small enough to (a) fit the default 32 MiB scoped VMEM on every generation
    # (incl. v7x's 64 MiB physical VMEM) and (b) keep >= 2 tiles for v7x megacore.
    if tile_b is None:
        tile_b = min(2048, _round_up(pl.cdiv(B, 2), 8))
    tile_b = max(8, min(_round_up(tile_b, 8), _round_up(B, 8)))
    n_tiles = pl.cdiv(B, tile_b)          # ragged last tile handled by Pallas

    def resident(arr):
        # Same block every grid step -> stays VMEM-resident, no per-tile re-DMA.
        nd = arr.ndim
        return pl.BlockSpec(arr.shape, lambda i, _nd=nd: (0,) * _nd)

    in_specs = [
        pl.BlockSpec((tile_b, D), lambda i: (i, 0)),             # x: pipelined over batch
        resident(kp["w1"]), resident(kp["b1"]),
        resident(kp["w2"]), resident(kp["b2"]),
        resident(kp["w3"]), resident(kp["b3"]),
        resident(kp["wide_mat"]), resident(kp["deep_mat"]),
    ]
    # Lane-dense output: one (1, 1, tile_b) block per grid step.
    out_specs = pl.BlockSpec((1, 1, tile_b), lambda i: (i, 0, 0))
    out_shape = jax.ShapeDtypeStruct((n_tiles, 1, tile_b), jnp.float32)

    d1 = kp["w1"].shape[1]
    d2 = kp["w2"].shape[1]
    d3p = kp["w3"].shape[1]
    weight_bytes = sum(int(np.prod(kp[k].shape)) * kp[k].dtype.itemsize
                       for k in ("w1", "b1", "w2", "b2", "w3", "b3",
                                 "wide_mat", "deep_mat"))
    cost = pl.CostEstimate(
        flops=2 * B * (D * d1 + d1 * d2 + d2 * d3p + 8 * (D + d3p)),
        transcendentals=0,
        bytes_accessed=B * D * x.dtype.itemsize + n_tiles * tile_b * 4 + weight_bytes,
    )

    out = pl.pallas_call(
        functools.partial(wide_deep_kernel, elementwise_bf16=elementwise_bf16),
        out_shape=out_shape,
        grid=(n_tiles,),
        in_specs=in_specs,
        out_specs=out_specs,
        compiler_params=pltpu.CompilerParams(
            dimension_semantics=("parallel",),   # megacore sharding on v7x
            vmem_limit_bytes=vmem_limit_bytes,   # v5e scoped default is only 16 MiB
        ),
        cost_estimate=cost,
    )(x, kp["w1"], kp["b1"], kp["w2"], kp["b2"], kp["w3"], kp["b3"],
      kp["wide_mat"], kp["deep_mat"])

    # Lane-dense (n_tiles, 1, tile_b) -> (B, 1); padded/ragged rows sliced off.
    return out.reshape(-1)[:B].reshape(B, 1)


# --------------------------------------------------------------------------- #
# References
# --------------------------------------------------------------------------- #
def reference_forward_f32(x, raw, eps=1e-5):
    """PyTorch-faithful eval-mode forward in pure f32 (no folding)."""
    wide_out = x @ raw["wide_w"] + raw["wide_b"]
    h = x
    for (w, b, gamma, beta, mean, var) in raw["deep"]:
        h = h @ w + b
        h = (h - mean) * gamma / jnp.sqrt(var + eps) + beta
        h = jnp.maximum(h, 0.0)                 # ReLU; Dropout == identity in eval
    deep_out = h @ raw["deep_out_w"] + raw["deep_out_b"]
    combined = jnp.concatenate([wide_out, deep_out], axis=1)
    return combined @ raw["out_w"][:, None] + raw["out_b"]


def reference_forward_folded(x, kp, elementwise_bf16=False):
    """Plain-JAX mirror of the kernel math (folding + dtype handling)."""
    mm_dtype = kp["w1"].dtype
    xf = x.astype(jnp.float32)
    wide = xf @ kp["wide_mat"][0]                                # (B,)
    h = x.astype(mm_dtype)
    layers = ((kp["w1"], kp["b1"]), (kp["w2"], kp["b2"]), (kp["w3"], kp["b3"]))
    for li, (w, b) in enumerate(layers):
        acc = jnp.dot(h, w, preferred_element_type=jnp.float32)
        last = li == len(layers) - 1
        if elementwise_bf16 and not last:
            h = jnp.maximum(acc.astype(jnp.bfloat16) + b.astype(jnp.bfloat16),
                            0).astype(mm_dtype)
        else:
            a = jnp.maximum(acc + b, 0.0)
            h = a if last else a.astype(mm_dtype)
    deep = h @ kp["deep_mat"][0]                                 # (B,)  (bias folded in)
    return (wide + deep)[:, None]


# --------------------------------------------------------------------------- #
# Demo / self-check
# --------------------------------------------------------------------------- #
if __name__ == "__main__":
    B, D = 64, 32
    deep_dims = (256, 128, 64)

    key = jax.random.PRNGKey(0)
    kx, kparams = jax.random.split(key)
    x = jax.random.normal(kx, (B, D), jnp.float32)

    raw = init_raw_params(kparams, D, deep_dims=deep_dims)
    kp = prepare_kernel_params(raw, use_bf16=True)

    # Default config: tile_b auto -> 32, grid of 2 tiles.
    out = jax.block_until_ready(wide_deep_forward(x, kp))
    assert out.shape == (B, 1)

    # Tight check vs. a plain-JAX mirror of the kernel math (same folds / bf16).
    ref_folded = reference_forward_folded(x, kp)
    np.testing.assert_allclose(np.asarray(out), np.asarray(ref_folded),
                               rtol=2e-2, atol=2e-2)

    # Sanity check vs. the PyTorch-faithful f32 forward (loose: bf16 matmuls).
    ref_f32 = reference_forward_f32(x, raw)
    np.testing.assert_allclose(np.asarray(out), np.asarray(ref_f32),
                               rtol=5e-2, atol=5e-2)

    # Ragged-last-tile path: tile that does not divide B (grid=3, last block OOB).
    out_ragged = jax.block_until_ready(wide_deep_forward(x, kp, tile_b=24))
    np.testing.assert_allclose(np.asarray(out_ragged), np.asarray(out),
                               rtol=1e-4, atol=1e-4)

    # bf16 bias/ReLU variant (v6e/v7x option) vs. its exact plain-JAX mirror.
    out_bf16ew = jax.block_until_ready(
        wide_deep_forward(x, kp, elementwise_bf16=True))
    ref_bf16ew = reference_forward_folded(x, kp, elementwise_bf16=True)
    np.testing.assert_allclose(np.asarray(out_bf16ew), np.asarray(ref_bf16ew),
                               rtol=2e-2, atol=2e-2)

    print("KERNEL_OK")
</pallas_src>

<mosaic_0001>
module attributes {stable_mosaic.version = 11 : i64} {
  func.func @wide_deep_kernel(%arg0: i32, %arg1: memref<32x32xf32, #tpu.memory_space<vmem>>, %arg2: memref<32x256xbf16, #tpu.memory_space<vmem>>, %arg3: memref<1x256xf32, #tpu.memory_space<vmem>>, %arg4: memref<256x128xbf16, #tpu.memory_space<vmem>>, %arg5: memref<1x128xf32, #tpu.memory_space<vmem>>, %arg6: memref<128x128xbf16, #tpu.memory_space<vmem>>, %arg7: memref<1x128xf32, #tpu.memory_space<vmem>>, %arg8: memref<8x32xf32, #tpu.memory_space<vmem>>, %arg9: memref<8x128xf32, #tpu.memory_space<vmem>>, %arg10: memref<1x1x32xf32, #tpu.memory_space<vmem>>) attributes {dimension_semantics = [#tpu.dimension_semantics<parallel>], iteration_bounds = array<i64: 2>, scalar_prefetch = 0 : i64, scratch_operands = 0 : i64, tpu.core_type = #tpu.core_type<tc>, window_params = [{transform_indices = @transform_0, window_bounds = array<i64: 32, 32>}, {pipeline_mode = #tpu.pipeline_mode<synchronous>, transform_indices = @transform_1, window_bounds = array<i64: 32, 256>}, {pipeline_mode = #tpu.pipeline_mode<synchronous>, transform_indices = @transform_2, window_bounds = array<i64: 1, 256>}, {pipeline_mode = #tpu.pipeline_mode<synchronous>, transform_indices = @transform_3, window_bounds = array<i64: 256, 128>}, {pipeline_mode = #tpu.pipeline_mode<synchronous>, transform_indices = @transform_4, window_bounds = array<i64: 1, 128>}, {pipeline_mode = #tpu.pipeline_mode<synchronous>, transform_indices = @transform_5, window_bounds = array<i64: 128, 128>}, {pipeline_mode = #tpu.pipeline_mode<synchronous>, transform_indices = @transform_6, window_bounds = array<i64: 1, 128>}, {pipeline_mode = #tpu.pipeline_mode<synchronous>, transform_indices = @transform_7, window_bounds = array<i64: 8, 32>}, {pipeline_mode = #tpu.pipeline_mode<synchronous>, transform_indices = @transform_8, window_bounds = array<i64: 8, 128>}, {transform_indices = @transform_9, window_bounds = array<i64: 1, 1, 32>}]} {
    %c0 = arith.constant 0 : index
    %c0_0 = arith.constant 0 : index
    %0 = vector.load %arg1[%c0, %c0_0] : memref<32x32xf32, #tpu.memory_space<vmem>>, vector<32x32xf32>
    %c0_1 = arith.constant 0 : index
    %c0_2 = arith.constant 0 : index
    %1 = vector.load %arg8[%c0_1, %c0_2] : memref<8x32xf32, #tpu.memory_space<vmem>>, vector<8x32xf32>
    %cst = arith.constant dense<0.000000e+00> : vector<8x32xf32>
    %2 = tpu.matmul %1, %0, %cst {dimension_numbers = #tpu.dot_dimension_numbers<[1], [1], [0], [0], [0, 0, 1, 0], [], []>} : vector<8x32xf32>, vector<32x32xf32>, vector<8x32xf32> -> vector<8x32xf32>
    %3 = arith.truncf %0 : vector<32x32xf32> to vector<32x32xbf16>
    %c0_3 = arith.constant 0 : index
    %c0_4 = arith.constant 0 : index
    %4 = vector.load %arg2[%c0_3, %c0_4] : memref<32x256xbf16, #tpu.memory_space<vmem>>, vector<32x256xbf16>
    %cst_5 = arith.constant dense<0.000000e+00> : vector<32x256xf32>
    %5 = tpu.matmul %3, %4, %cst_5 {dimension_numbers = #tpu.dot_dimension_numbers<[1], [0], [0], [1], [0, 0, 1, 1], [], []>} : vector<32x32xbf16>, vector<32x256xbf16>, vector<32x256xf32> -> vector<32x256xf32>
    %c0_6 = arith.constant 0 : index
    %c0_7 = arith.constant 0 : index
    %6 = vector.load %arg3[%c0_6, %c0_7] : memref<1x256xf32, #tpu.memory_space<vmem>>, vector<1x256xf32>
    %7 = vector.broadcast %6 : vector<1x256xf32> to vector<32x256xf32>
    %8 = arith.addf %5, %7 : vector<32x256xf32>
    %cst_8 = arith.constant 0.000000e+00 : f32
    %9 = vector.broadcast %cst_8 : f32 to vector<32x256xf32>
    %10 = arith.maximumf %8, %9 : vector<32x256xf32>
    %11 = arith.truncf %10 : vector<32x256xf32> to vector<32x256xbf16>
    %c0_9 = arith.constant 0 : index
    %c0_10 = arith.constant 0 : index
    %12 = vector.load %arg4[%c0_9, %c0_10] : memref<256x128xbf16, #tpu.memory_space<vmem>>, vector<256x128xbf16>
    %cst_11 = arith.constant dense<0.000000e+00> : vector<32x128xf32>
    %13 = tpu.matmul %11, %12, %cst_11 {dimension_numbers = #tpu.dot_dimension_numbers<[1], [0], [0], [1], [0, 0, 1, 1], [], []>} : vector<32x256xbf16>, vector<256x128xbf16>, vector<32x128xf32> -> vector<32x128xf32>
    %c0_12 = arith.constant 0 : index
    %c0_13 = arith.constant 0 : index
    %14 = vector.load %arg5[%c0_12, %c0_13] : memref<1x128xf32, #tpu.memory_space<vmem>>, vector<1x128xf32>
    %15 = vector.broadcast %14 : vector<1x128xf32> to vector<32x128xf32>
    %16 = arith.addf %13, %15 : vector<32x128xf32>
    %cst_14 = arith.constant 0.000000e+00 : f32
    %17 = vector.broadcast %cst_14 : f32 to vector<32x128xf32>
    %18 = arith.maximumf %16, %17 : vector<32x128xf32>
    %19 = arith.truncf %18 : vector<32x128xf32> to vector<32x128xbf16>
    %c0_15 = arith.constant 0 : index
    %c0_16 = arith.constant 0 : index
    %20 = vector.load %arg6[%c0_15, %c0_16] : memref<128x128xbf16, #tpu.memory_space<vmem>>, vector<128x128xbf16>
    %cst_17 = arith.constant dense<0.000000e+00> : vector<32x128xf32>
    %21 = tpu.matmul %19, %20, %cst_17 {dimension_numbers = #tpu.dot_dimension_numbers<[1], [0], [0], [1], [0, 0, 1, 1], [], []>} : vector<32x128xbf16>, vector<128x128xbf16>, vector<32x128xf32> -> vector<32x128xf32>
    %c0_18 = arith.constant 0 : index
    %c0_19 = arith.constant 0 : index
    %22 = vector.load %arg7[%c0_18, %c0_19] : memref<1x128xf32, #tpu.memory_space<vmem>>, vector<1x128xf32>
    %23 = vector.broadcast %22 : vector<1x128xf32> to vector<32x128xf32>
    %24 = arith.addf %21, %23 : vector<32x128xf32>
    %cst_20 = arith.constant 0.000000e+00 : f32
    %25 = vector.broadcast %cst_20 : f32 to vector<32x128xf32>
    %26 = arith.maximumf %24, %25 : vector<32x128xf32>
    %c0_21 = arith.constant 0 : index
    %c0_22 = arith.constant 0 : index
    %27 = vector.load %arg9[%c0_21, %c0_22] : memref<8x128xf32, #tpu.memory_space<vmem>>, vector<8x128xf32>
    %cst_23 = arith.constant dense<0.000000e+00> : vector<8x32xf32>
    %28 = tpu.matmul %27, %26, %cst_23 {dimension_numbers = #tpu.dot_dimension_numbers<[1], [1], [0], [0], [0, 0, 1, 0], [], []>} : vector<8x128xf32>, vector<32x128xf32>, vector<8x32xf32> -> vector<8x32xf32>
    %29 = vector.extract_strided_slice %2 {offsets = [0, 0], sizes = [1, 32], strides = [1, 1]} : vector<8x32xf32> to vector<1x32xf32>
    %30 = vector.extract_strided_slice %28 {offsets = [0, 0], sizes = [1, 32], strides = [1, 1]} : vector<8x32xf32> to vector<1x32xf32>
    %31 = arith.addf %29, %30 : vector<1x32xf32>
    %32 = vector.shape_cast %31 : vector<1x32xf32> to vector<1x1x32xf32>
    %c0_24 = arith.constant 0 : index
    %c0_25 = arith.constant 0 : index
    %c0_26 = arith.constant 0 : index
    %33 = vector.load %arg10[%c0_24, %c0_25, %c0_26] : memref<1x1x32xf32, #tpu.memory_space<vmem>>, vector<1x1x32xf32>
    tpu.vector_store %arg10[%c0_24, %c0_25, %c0_26], %32 {strides = array<i32>} : memref<1x1x32xf32, #tpu.memory_space<vmem>>, vector<1x1x32xf32>,
    return
  }
  func.func @transform_0(%arg0: i32) -> (i32, i32) {
    %c0_i32 = arith.constant 0 : i32
    %c0_i32_0 = arith.constant 0 : i32
    return %arg0, %c0_i32 : i32, i32
  }
  func.func @transform_1(%arg0: i32) -> (i32, i32) {
    %c0_i32 = arith.constant 0 : i32
    %c0_i32_0 = arith.constant 0 : i32
    %c0_i32_1 = arith.constant 0 : i32
    return %c0_i32, %c0_i32_0 : i32, i32
  }
  func.func @transform_2(%arg0: i32) -> (i32, i32) {
    %c0_i32 = arith.constant 0 : i32
    %c0_i32_0 = arith.constant 0 : i32
    %c0_i32_1 = arith.constant 0 : i32
    return %c0_i32, %c0_i32_0 : i32, i32
  }
  func.func @transform_3(%arg0: i32) -> (i32, i32) {
    %c0_i32 = arith.constant 0 : i32
    %c0_i32_0 = arith.constant 0 : i32
    %c0_i32_1 = arith.constant 0 : i32
    return %c0_i32, %c0_i32_0 : i32, i32
  }
  func.func @transform_4(%arg0: i32) -> (i32, i32) {
    %c0_i32 = arith.constant 0 : i32
    %c0_i32_0 = arith.constant 0 : i32
    %c0_i32_1 = arith.constant 0 : i32
    return %c0_i32, %c0_i32_0 : i32, i32
  }
  func.func @transform_5(%arg0: i32) -> (i32, i32) {
    %c0_i32 = arith.constant 0 : i32
    %c0_i32_0 = arith.constant 0 : i32
    %c0_i32_1 = arith.constant 0 : i32
    return %c0_i32, %c0_i32_0 : i32, i32
  }
  func.func @transform_6(%arg0: i32) -> (i32, i32) {
    %c0_i32 = arith.constant 0 : i32
    %c0_i32_0 = arith.constant 0 : i32
    %c0_i32_1 = arith.constant 0 : i32
    return %c0_i32, %c0_i32_0 : i32, i32
  }
  func.func @transform_7(%arg0: i32) -> (i32, i32) {
    %c0_i32 = arith.constant 0 : i32
    %c0_i32_0 = arith.constant 0 : i32
    %c0_i32_1 = arith.constant 0 : i32
    return %c0_i32, %c0_i32_0 : i32, i32
  }
  func.func @transform_8(%arg0: i32) -> (i32, i32) {
    %c0_i32 = arith.constant 0 : i32
    %c0_i32_0 = arith.constant 0 : i32
    %c0_i32_1 = arith.constant 0 : i32
    return %c0_i32, %c0_i32_0 : i32, i32
  }
  func.func @transform_9(%arg0: i32) -> (i32, i32, i32) {
    %c0_i32 = arith.constant 0 : i32
    %c0_i32_0 = arith.constant 0 : i32
    %c0_i32_1 = arith.constant 0 : i32
    return %arg0, %c0_i32, %c0_i32_0 : i32, i32, i32
  }
}

</mosaic_0001>

<bundles_post_ra>
// kernel: tpu_custom_call.1
= control target key start
LH: loop header
LB: loop body
LE: loop exit
PB: predicated region body
PF: predicated region fallthrough
CT: control target
= control target key end

     0   :  { %14 = vsyncpa [#allocation3], 0  ;;  %s1708_s0 = inlined_call_operand.vmem [shape: f32[64,32], index: 0, kind: input, shape index: {}]   ;;  %s1709_s1 = inlined_call_operand.vmem [shape: bf16[32,256], index: 1, kind: input, shape index: {}]   ;;  %s1710_s2 = inlined_call_operand.vmem [shape: f32[1,256], index: 2, kind: input, shape index: {}]   ;;  %s1711_s3 = inlined_call_operand.hbm [shape: bf16[256,128], index: 3, kind: input, shape index: {}]   ;;  %s1712_s4 = inlined_call_operand.hbm [shape: f32[1,128], index: 4, kind: input, shape index: {}]   ;;  %s1713_s5 = inlined_call_operand.vmem [shape: bf16[128,128], index: 5, kind: input, shape index: {}]   ;;  %s1714_s6 = inlined_call_operand.vmem [shape: f32[1,128], index: 6, kind: input, shape index: {}]   ;;  %s1715_s7 = inlined_call_operand.vmem [shape: f32[8,32], index: 7, kind: input, shape index: {}]   ;;  %s1716_s8 = inlined_call_operand.vmem [shape: f32[8,128], index: 8, kind: input, shape index: {}]   ;;  %s1717_s9 = inlined_call_operand.hbm [shape: f32[2,1,32], index: 9, kind: output, shape index: {}]  }
   0x1   :  { %15 = vsyncpa [#allocation6], 0 }
   0x2   :  { %16 = vsyncpa [#allocation4], 0 }
   0x3   :  { %18 = vsyncpa [#allocation4 + $0x1], 0  ;;  %s1477_s30 = smov 0   ;;  %s1479_s10 = smov 0  }
   0x4   :  { %s1481_s11 = smov 0   ;;  %s1483_s12 = smov 0  }
   0x5 LB: > { %1724 = sst [smem:[#allocation11_spill]] %s1412_s11  ;;  %s1498_s13 = sadd.s32 4294967295, %s1416_s12   ;;  %s1416_s12 = sphi %s1483_s12, %s1738_s12   ;;  %s1412_s11 = sphi %s1481_s11, %s1743_s11   ;;  %s1408_s10 = sphi %s1479_s10, %s1742_s10   ;;  %s1404_s30 = sphi %s1477_s30, %s1741_s30  }
   0x6   : > { %s1039_s14 = sadd.s32 4294967294, %s1416_s12   ;;  %s1502_s15 = sadd.s32 1, %s1416_s12  }
   0x7   : > { %1725 = sst [smem:[#allocation12_spill]] %s1502_s15  ;;  %s225_s16 = sadd.s32 1, %s1412_s11 }
   0x8   : > { %s222_s17 = ssub.s32 %s1416_s12, %s1502_s15  ;;  %p235_p0 = scmp.ne.s32.totalorder %s1412_s11, %s1408_s10 }
   0x9   : > { %p223_p1 = scmp.eq.s32.totalorder %s222_s17, 0  ;;  %p236_p2 = scmp.eq.s32.totalorder %s1498_s13, 1 }
   0xa   : > { %p241_p3 = scmp.ne.s32.totalorder %s1408_s10, %s1404_s30  ;;  %p242_p4 = scmp.eq.s32.totalorder %s1039_s14, 1 }
   0xb   : > { %s1513_s18 = scalar_select %p223_p1, %s1412_s11, %s225_s16  }
   0xc   : > { %p1515_p5 = por %p236_p2, %p235_p0  ;;  %p1519_p6 = por %p242_p4, %p241_p3 }
   0xd   : > { %1726 = sst [smem:[#allocation13_spill]] %s1513_s18  ;;  %p1040_p7 = scmp.ge.s32.totalorder %s1416_s12, 1 }
   0xe   : > { %s1727_s19 = scalar_select %p1515_p5, 1, 0 }
   0xf   : > { %s1728_s20 = scalar_select %p1519_p6, 1, 0 }
  0x10   : > { %p249_p8 = scmp.lt.s32.totalorder %s1416_s12, 3  ;;  %p1718_p9 = scmp.eq.s32.totalorder %s1498_s13, 0 }
  0x11   : > { %s1418_s22 = smov [#allocation2]   ;;  %s1419_s25 = smov [#allocation5]  }
  0x12   : > { %p1526_p10 = pnand %p1040_p7, %p249_p8  ;;  %s267_s23 = sshll.u32 %s1418_s22, 4  ;;  %s268_s23 = int_to_ptr.vmem [resolvable:$true] %s267_s23 }
  0x13   : > { %s281_s26 = sshll.u32 %s1419_s25, 4  ;;  %s1290_s29 = scalar_lea.hbm %s1711_s3, 2048  ;;  %s1538_s26 = int_to_ptr.vmem [resolvable:$true] %s281_s26 }
  0x14   : > { %s1729_s21 = scalar_select %p1526_p10, 1, 0 }
  0x15   : > { %p1204_p11 = pneg %p1526_p10  ;;  %p1291_p13 = scmp.ne.s32.totalorder %s1711_s3, %s1290_s29 }
  0x16   : > { %p1297_p3 = scmp.lt.u32.totalorder %s1290_s29, %s1711_s3 }
  0x17   : > { %p1534_p12 = pnand %p1718_p9, %p1204_p11 }
  0x19   : > { %p1292_p0 = pneg %p1534_p12 }
  0x1b   : > { %p1293_p1 = pnand %p1292_p0, %p1291_p13 }
  0x1d   : > { %p1294_p2 = pneg %p1293_p1 }
  0x1f   : > { %p1299_p4 = pnand %p1297_p3, %p1294_p2 }
  0x21   : > { %1302 = shalt.err (!%p1299_p4)
}
  0x22   : > { %s1303_s25 = scalar_lea.vmem %s268_s23, 2048  ;;  %p1311_p9 = scmp.lt.s32.totalorder %s268_s23, %s268_s23 }
  0x23   : > { %p1304_p7 = scmp.ne.s32.totalorder %s268_s23, %s1303_s25  ;;  %p1312_p6 = scmp.lt.s32.totalorder %s1303_s25, %s1303_s25 }
  0x25   : > { %p1306_p8 = pnand %p1304_p7, %p1292_p0  ;;  %p1313_p5 = por %p1312_p6, %p1311_p9 }
  0x27   : > { %p1307_p11 = pneg %p1306_p8 }
  0x29   : > { %p1314_p10 = pnand %p1313_p5, %p1307_p11 }
  0x2b   : > { %1317 = shalt.err (!%p1314_p10)
}
  0x2c   : > { %s1420_s27 = smov 64   ;;  %s1421_s28 = smov 4  }
  0x2d   : > { %1207 = dma.hbm_to_vmem [thread:$0]  (!%p1534_p12), %s1711_s3, 2048, %s268_s23, [#allocation3], %s1420_s27, %s1420_s27, %s1421_s28  }
  0x2e   : > { %s1318_s22 = scalar_lea.hbm %s1712_s4, 16 }
  0x2f   : > { %p1319_p13 = scmp.ne.s32.totalorder %s1712_s4, %s1318_s22  ;;  %p1325_p9 = scmp.lt.u32.totalorder %s1318_s22, %s1712_s4 }
  0x31   : > { %p1321_p5 = pnand %p1319_p13, %p1292_p0 }
  0x33   : > { %p1322_p6 = pneg %p1321_p5 }
  0x35   : > { %p1327_p10 = pnand %p1325_p9, %p1322_p6 }
  0x37   : > { %1330 = shalt.err (!%p1327_p10)
}
  0x38   : > { %s1331_s23 = scalar_lea.vmem %s1538_s26, 16  ;;  %s1338_s11 = scalar_lea.vmem %s1538_s26, 32 }
  0x39   : > { %p1332_p1 = scmp.ne.s32.totalorder %s1538_s26, %s1331_s23  ;;  %p1339_p4 = scmp.lt.s32.totalorder %s1538_s26, %s1538_s26 }
  0x3a   : > { %p1340_p7 = scmp.lt.s32.totalorder %s1338_s11, %s1331_s23 }
  0x3b   : > { %p1334_p2 = pnand %p1332_p1, %p1292_p0 }
  0x3c   : > { %p1341_p8 = por %p1340_p7, %p1339_p4 }
  0x3d   : > { %p1335_p3 = pneg %p1334_p2 }
  0x3f   : > { %p1342_p11 = pnand %p1341_p8, %p1335_p3 }
  0x41   : > { %1345 = shalt.err (!%p1342_p11)
}
  0x42   : > { %1210 = dma.hbm_to_vmem [thread:$0]  (!%p1534_p12), %s1712_s4, 16, %s1538_s26, [#allocation6]  }
  0x43   : > { %p1731_p13 = scmp.ne.s32.totalorder %s1729_s21, 0 }
  0x44   : > { %p1732_p0 = scmp.eq.s32.totalorder (!%p1731_p13), %s1498_s13, 0 }
  0x45   : > { %315 = sbr.rel (%p1731_p13) target bundleno = 1006 (0x3ee), region = 56 }
  0x4c   : > { %1391 = dma.done.wait (%p1732_p0), [#allocation3], 2048   ;;  %p1733_p5 = pmov %p1732_p0 }
  0x4d   : > { %p1734_p6 = pmov %p1732_p0 }
  0x4e   : > { %1393 = vsyncadd (%p1733_p5), [#allocation3], 4294965248 }
  0x4f   : > { %1395 = dma.done.wait (%p1734_p6), [#allocation6], 16   ;;  %p1735_p9 = pmov %p1732_p0 }
  0x50   : > { %s1047_s24 = sshll.u32 %s1498_s13, 2  ;;  %v1422_v0 = vmov 0   ;;  %v1260_v1 = vld [vmem:[%s1709_s1 + $0x4] ss:$8 sps:$4 sm:$0xff]   ;;  %v1262_v2 = vld [vmem:[%s1709_s1] ss:$8 sps:$4 sm:$0xff]   ;;  %v460_v33 = vlaneseq }
  0x51   : > { %1397 = vsyncadd (%p1735_p9), [#allocation6], 4294967280  ;;  %528 = vmatprep.mubr.bf16.mxu1 %v1422_v0  ;;  %p355_p12 = scmp.lt.s32.totalorder %s1047_s24, 7  ;;  %496 = vmatprep.subr.bf16.mxu1 %v1260_v1  ;;  %v1263_v3 = vld [vmem:[%s1709_s1 + $0x14] ss:$8 sps:$4 sm:$0xff]   ;;  %v1266_v7 = vld [vmem:[#allocation2 + $0x40] sm:$0xff]  }
  0x52   : > { %497 = vmatpush1.bf16.msra.mxu1 %v1262_v2  ;;  %v1265_v4 = vld [vmem:[%s1709_s1 + $0x10] ss:$8 sps:$4 sm:$0xff]   ;;  %vm366_vm0 = vcmask 261120   ;;  %v1267_v9 = vld [vmem:[#allocation2] sm:$0xff]   ;;  %v1268_v10 = vld [vmem:[#allocation2 + $0x48] sm:$0xff]   ;;  %v1423_v27 = vmov 0.0|0.0  }
  0x53   : > { %s1745_s24 = smov (!%p355_p12, %s1047_s24), 7  ;;  %498 = vmatprep.subr.bf16.mxu1 %v1263_v3  ;;  %v1269_v13 = vld [vmem:[#allocation2 + $0x8] sm:$0xff]   ;;  %v1270_v14 = vld [vmem:[#allocation2 + $0x50] sm:$0xff]   ;;  %v1272_v17 = vld [vmem:[#allocation2 + $0x58] sm:$0xff]   ;;  %1179 = vmatprep.subr.bf16.mxu0 %v1423_v27  ;;  %vm1424_vm2 = vmmov 0   ;;  %v1425_v28 = vmov 0.0  }
  0x54   : > { %s1048_s21 = sshll.u32 %s1745_s24, 3  ;;  %v1271_v16 = vld [vmem:[#allocation2 + $0x10] sm:$0xff]   ;;  %v1273_v18 = vld [vmem:[#allocation2 + $0x18] sm:$0xff]   ;;  %v1274_v19 = vld [vmem:[#allocation2 + $0x60] sm:$0xff]   ;;  %1145 = vmatprep.mubr.msk.f32.mxu0 %vm1424_vm2, %v1425_v28  ;;  %v461_v34 = vshrl.u32 %v460_v33, 7  ;;  %s352_s16 = sand.u32 1, %s1408_s10  }
  0x55   : > { %s358_s14 = scalar_lea.vmem %s1708_s0, %s1048_s21  ;;  %v1275_v20 = vld [vmem:[#allocation2 + $0x20] sm:$0xff]   ;;  %v1276_v21 = vld [vmem:[#allocation2 + $0x68] sm:$0xff]   ;;  %v1278_v23 = vld [vmem:[#allocation2 + $0x70] sm:$0xff]   ;;  %s1086_s17 = sshll.u32 %s1498_s13, 4  ;;  %vm947_vm3 = vcmask 253952  }
  0x56   : > { %v361_v5 = vld [vmem:[%s358_s14] sm:$0xff]  ;;  %v362_v6 = vld [vmem:[%s358_s14 + $0x8] sm:$0xff]  ;;  %499 = vmatpush1.bf16.msra.mxu1 %v1265_v4  ;;  %v363_v11 = vld [vmem:[%s358_s14 + $0x10] sm:$0xff]  ;;  %v462_v35 = vsub.s32 0, %v461_v34  ;;  %v466_v37 = vsub.s32 1, %v461_v34  ;;  %s353_s22 = scalar_lea.vmem [#allocation7], %s352_s16  ;;  %s1666_s15 = scalar_lea.hbm %s1717_s9, %s1086_s17 }
  0x57   : > { %v1180_v8 = vpack.c.bf16 %v362_v6, %v361_v5  ;;  %1094 = vmatprep.subr.bf16.mxu1 %v1266_v7  ;;  %v364_v12 = vld [vmem:[%s358_s14 + $0x18] sm:$0xff]  ;;  %v1277_v22 = vld [vmem:[#allocation2 + $0x28] sm:$0xff]   ;;  %v1279_v24 = vld [vmem:[#allocation2 + $0x30] sm:$0xff]   ;;  %s962_s25 = sshll.u32 %s353_s22, 4  ;;  %s950_s18 = scalar_lea.sflag [#allocation4], %s352_s16  ;;  %s1668_s25 = int_to_ptr.vmem [resolvable:$true] %s962_s25 }
  0x58   : > { %v1184_v15 = vpack.c.bf16 %v364_v12, %v363_v11  ;;  %v1280_v25 = vld [vmem:[#allocation2 + $0x78] sm:$0xff]   ;;  %vm1181_vm1 = vmpackc.low %vm366_vm0, %vm366_vm0  ;;  %v1282_v29 = vld [vmem:[%s1713_s5] sm:$0xff]   ;;  %s1346_s24 = scalar_lea.vmem %s1668_s25, 16  ;;  %p1736_p1 = scmp.ne.s32.totalorder %s1727_s19, 0 }
  0x59   : > { %1058 = vmatmul.mubr.msk.bf16.vlgmr.msra.gmra.mrb[0].mxu1 %vm366_vm0, %v1180_v8  ;;  %v1281_v26 = vld [vmem:[#allocation2 + $0x38] sm:$0xff]   ;;  %1182 = vmatpush3.bf16.xpose.msk.msra.mxu0 %vm1181_vm1, %v1180_v8  ;;  %v365_v30 = vld [vmem:[%s1715_s7] sm:$0xff]  ;;  %v1283_v31 = vld [vmem:[%s1713_s5 + $0x8] sm:$0xff]   ;;  %p1347_p10 = scmp.ne.s32.totalorder %s1668_s25, %s1346_s24  ;;  %s1426_s13 = smov [#allocation7]  }
  0x5a   : > { %538 = vmatprep.mubr.bf16.mxu1 %v1422_v0  ;;  %1095 = vmatpush3.bf16.msra.mxu1 %v1267_v9  ;;  %v1284_v32 = vld [vmem:[%s1713_s5 + $0x10] sm:$0xff]   ;;  %v458_v36 = vld [vmem:[%s1710_s2] sm:$0x3]  ;;  %v1285_v4 = vld [vmem:[%s1713_s5 + $0x18] sm:$0xff]   ;;  %s1350_s21 = sshll.u32 %s1426_s13, 4  ;;  %s1351_s21 = int_to_ptr.vmem [resolvable:$false] %s1350_s21 }
  0x5b   : > { %1096 = vmatprep.subr.bf16.mxu1 %v1268_v10  ;;  %1183 = vmatprep.subr.bf16.mxu0 %v1423_v27  ;;  %v463_v38 = vrot.slane %v458_v36, %v462_v35  ;;  %v467_v39 = vrot.slane %v458_v36, %v466_v37  ;;  %v1286_v5 = vld [vmem:[%s1713_s5 + $0x20] sm:$0xff]   ;;  %v1287_v6 = vld [vmem:[%s1713_s5 + $0x28] sm:$0xff]   ;;  %v1288_v7 = vld [vmem:[%s1713_s5 + $0x30] sm:$0xff]   ;;  %p1348_p2 = pnand %p1347_p10, %p1736_p1  ;;  %s1352_s26 = scalar_lea.vmem %s1351_s21, 32 }
  0x5c   : > { %v1289_v8 = vld [vmem:[%s1713_s5 + $0x38] sm:$0xff]   ;;  %v1060_v12 = vld [vmem:[#allocation5] ss:$0 sm:$0xff]  ;;  %p1353_p4 = scmp.lt.s32.totalorder %s1668_s25, %s1351_s21  ;;  %p1354_p7 = scmp.lt.s32.totalorder %s1352_s26, %s1346_s24 }
  0x5d   : > { %v1077_v35 = vld [vmem:[%s1714_s6] ss:$0 sm:$0xff]  ;;  %p1349_p3 = pneg %p1348_p2 }
  0x5e   : > { %1097 = vmatpush3.bf16.msra.mxu1 %v1269_v13  ;;  %p1355_p8 = por %p1354_p7, %p1353_p4 }
  0x5f   : > { %1098 = vmatprep.subr.bf16.mxu1 %v1270_v14 }
  0x60   : > { %p1356_p11 = pnand %p1355_p8, %p1349_p3 }
  0x61   : > { %1059 = vmatmul.mubr.msk.bf16.gmra.mrb[4].mxu1 %vm366_vm0, %v1184_v15  ;;  %1186 = vmatpush3.bf16.xpose.msk.msra.mxu0 %vm1181_vm1, %v1184_v15 }
  0x62   : > { %1099 = vmatpush3.bf16.msra.mxu1 %v1271_v16  ;;  %1148 = vmatprep.subr.bf16.mxu0 %v1282_v29 }
  0x63   : > { %1100 = vmatprep.subr.bf16.mxu1 %v1272_v17 }
  0x66   : > { %1101 = vmatpush3.bf16.msra.mxu1 %v1273_v18 }
  0x67   : > { %1102 = vmatprep.subr.bf16.mxu1 %v1274_v19 }
  0x68   : > { %1146 = vmatmul.mubr.msk.f32.vlgmr.msra.gmra.mrb[0].mxu0 %vm366_vm0, %v365_v30 }
  0x69   : > { %1149 = vmatpush3.bf16.msra.mxu0 %v1282_v29 }
  0x6a   : > { %1103 = vmatpush3.bf16.msra.mxu1 %v1275_v20  ;;  %1150 = vmatprep.subr.bf16.mxu0 %v1283_v31 }
  0x6b   : > { %1104 = vmatprep.subr.bf16.mxu1 %v1276_v21 }
  0x6d   : > { %1151 = vmatpush3.bf16.msra.mxu0 %v1283_v31 }
  0x6e   : > { %1105 = vmatpush3.bf16.msra.mxu1 %v1277_v22  ;;  %1152 = vmatprep.subr.bf16.mxu0 %v1284_v32 }
  0x6f   : > { %1106 = vmatprep.subr.bf16.mxu1 %v1278_v23 }
  0x71   : > { %1153 = vmatpush3.bf16.msra.mxu0 %v1284_v32 }
  0x72   : > { %1107 = vmatpush3.bf16.msra.mxu1 %v1279_v24  ;;  %1154 = vmatprep.subr.bf16.mxu0 %v1285_v4 }
  0x73   : > { %1108 = vmatprep.subr.bf16.mxu1 %v1280_v25 }
  0x75   : > { %1155 = vmatpush3.bf16.msra.mxu0 %v1285_v4 }
  0x76   : > { %1109 = vmatpush3.bf16.msra.mxu1 %v1281_v26  ;;  %1156 = vmatprep.subr.bf16.mxu0 %v1286_v5 }
  0x77   : > { %1187 = vmatprep.subr.bf16.mxu1 %v1423_v27 }
  0x79   : > { %1157 = vmatpush3.bf16.msra.mxu0 %v1286_v5 }
  0x7a   : > { %1158 = vmatprep.subr.bf16.mxu0 %v1287_v6 }
  0x7d   : > { %1159 = vmatpush3.bf16.msra.mxu0 %v1287_v6 }
  0x7e   : > { %1160 = vmatprep.subr.bf16.mxu0 %v1288_v7 }
  0x81   : > { %1161 = vmatpush3.bf16.msra.mxu0 %v1288_v7 }
  0x82   : > { %1162 = vmatprep.subr.bf16.mxu0 %v1289_v8 }
  0x85   : > { %1163 = vmatpush3.bf16.msra.mxu0 %v1289_v8 }
 0x12c   : > { %v530_v40 = vpop.f32.mrb[0].mxu1 }
 0x12d   : > { %v531_v41 = vadd.f32 %v530_v40, %v463_v38  ;;  %v532_v42 = vpop.f32.mrb[1].mxu1 }
 0x12e   : > { %v533_v43 = vadd.f32 %v532_v42, %v467_v39  ;;  %v534_v44 = vpop.f32.mrb[2].mxu1 }
 0x12f   : > { %v535_v45 = vadd.f32 %v534_v44, %v463_v38  ;;  %v536_v46 = vpop.f32.mrb[3].mxu1  ;;  %v549_v48 = vmax.f32 %v531_v41, 0.0 }
 0x130   : > { %v537_v47 = vadd.f32 %v536_v46, %v467_v39  ;;  %v550_v50 = vmax.f32 %v533_v43, 0.0 }
 0x131   : > { %v551_v49 = vmax.f32 %v535_v45, 0.0 }
 0x132   : > { %v552_v51 = vmax.f32 %v537_v47, 0.0 }
 0x133   : > { %v557_v52 = vpack.c.bf16 %v551_v49, %v549_v48 }
 0x134   : > { %v558_v53 = vpack.c.bf16 %v552_v51, %v550_v50  ;;  %v540_v54 = vpop.f32.mrb[4].mxu1  ;;  %v875_v50 = vld [vmem:[%s1716_s8] sm:$0xff] }
 0x135   : > { %v541_v55 = vadd.f32 %v540_v54, %v463_v38  ;;  %v542_v56 = vpop.f32.mrb[5].mxu1 }
 0x136   : > { %v543_v57 = vadd.f32 %v542_v56, %v467_v39  ;;  %v544_v58 = vpop.f32.mrb[6].mxu1  ;;  %728 = vmatprep.mubr.bf16.mxu1 %v558_v53 }
 0x137   : > { %v545_v59 = vadd.f32 %v544_v58, %v463_v38  ;;  %v546_v60 = vpop.f32.mrb[7].mxu1  ;;  %729 = vmatmul.mubr.bf16.vlgmr.msra.gmra.mrb[8].mxu1 %v557_v52  ;;  %v553_v62 = vmax.f32 %v541_v55, 0.0 }
 0x138   : > { %v547_v61 = vadd.f32 %v546_v60, %v467_v39  ;;  %v554_v0 = vmax.f32 %v543_v57, 0.0 }
 0x139   : > { %v555_v63 = vmax.f32 %v545_v59, 0.0 }
 0x13a   : > { %v556_v1 = vmax.f32 %v547_v61, 0.0 }
 0x13b   : > { %v559_v2 = vpack.c.bf16 %v555_v63, %v553_v62  ;;  %v448_v9 = vpop.f32.mrb[0].mxu0 }
 0x13c   : > { %v560_v3 = vpack.c.bf16 %v556_v1, %v554_v0  ;;  %v1147_v10 = vpop.f32.mrb[1].mxu0 }
 0x13e   : > { %736 = vmatprep.mubr.bf16.mxu1 %v560_v3 }
 0x13f   : > { %737 = vmatmul.mubr.bf16.gmra.mrb[12].mxu1 %v559_v2 }
 0x140   : > { %1176 = vmatprep.mubr.msk.f32.mxu1 %vm1424_vm2, %v1425_v28 }
 0x20a   : > { %v1110_v11 = vpop.f32.mrb[8].mxu1 }
 0x20b   : > { %v1111_v13 = vpop.f32.mrb[9].mxu1 }
 0x20c   : > { %v1112_v14 = vadd.f32 %v1111_v13, %v1110_v11  ;;  %v1113_v15 = vpop.f32.mrb[10].mxu1 }
 0x20d   : > { %v1114_v16 = vpop.f32.mrb[11].mxu1 }
 0x20e   : > { %v731_v17 = vadd.f32 %v1112_v14, %v1060_v12  ;;  %v1115_v18 = vadd.f32 %v1114_v16, %v1113_v15 }
 0x210   : > { %v734_v19 = vadd.f32 %v1115_v18, %v1060_v12  ;;  %v745_v20 = vmax.f32 %v731_v17, 0.0 }
 0x212   : > { %v746_v21 = vmax.f32 %v734_v19, 0.0  ;;  %v1116_v22 = vpop.f32.mrb[12].mxu1 }
 0x213   : > { %v1117_v23 = vpop.f32.mrb[13].mxu1 }
 0x214   : > { %v1118_v24 = vadd.f32 %v1117_v23, %v1116_v22  ;;  %v1119_v25 = vpop.f32.mrb[14].mxu1  ;;  %v749_v26 = vpack.c.bf16 %v746_v21, %v745_v20 }
 0x215   : > { %v1120_v28 = vpop.f32.mrb[15].mxu1 }
 0x216   : > { %v739_v29 = vadd.f32 %v1118_v24, %v1060_v12  ;;  %v1121_v30 = vadd.f32 %v1120_v28, %v1119_v25  ;;  %1164 = vmatprep.mubr.bf16.mxu0 %v749_v26 }
 0x218   : > { %v742_v31 = vadd.f32 %v1121_v30, %v1060_v12  ;;  %v747_v32 = vmax.f32 %v739_v29, 0.0 }
 0x21a   : > { %v748_v33 = vmax.f32 %v742_v31, 0.0 }
 0x21c   : > { %v750_v34 = vpack.c.bf16 %v748_v33, %v747_v32 }
 0x21e   : > { %1165 = vmatmul.mubr.bf16.vlgmr.msra.gmra.mrb[4].mxu0 %v750_v34 }
 0x2f1   : > { %v1166_v36 = vpop.f32.mrb[4].mxu0 }
 0x2f2   : > { %v865_v37 = vadd.f32 %v1166_v36, %v1077_v35  ;;  %v856_v38 = vpop.f32.mrb[5].mxu0 }
 0x2f3   : > { %v857_v39 = vadd.f32 %v1077_v35, %v856_v38  ;;  %v1167_v40 = vpop.f32.mrb[6].mxu0 }
 0x2f4   : > { %v868_v41 = vadd.f32 %v1167_v40, %v1077_v35  ;;  %v859_v42 = vpop.f32.mrb[7].mxu0  ;;  %v873_v44 = vmax.f32 %v865_v37, 0.0 }
 0x2f5   : > { %v860_v43 = vadd.f32 %v1077_v35, %v859_v42  ;;  %v871_v46 = vmax.f32 %v857_v39, 0.0 }
 0x2f6   : > { %v874_v45 = vmax.f32 %v868_v41, 0.0 }
 0x2f7   : > { %v872_v47 = vmax.f32 %v860_v43, 0.0 }
 0x2f8   : > { %v1191_v48 = vpack.c.bf16 %v874_v45, %v873_v44 }
 0x2f9   : > { %v1188_v49 = vpack.c.bf16 %v872_v47, %v871_v46 }
 0x2fb   : > { %1189 = vmatpush3.bf16.xpose.msra.mxu1 %v1188_v49 }
 0x2fc   : > { %1190 = vmatprep.subr.bf16.mxu1 %v1423_v27 }
 0x303   : > { %1192 = vmatpush3.bf16.xpose.msra.mxu1 %v1191_v48 }
 0x30a   : > { %1177 = vmatmul.mubr.f32.vlgmr.msra.gmra.mrb[16].mxu1 %v875_v50 }
 0x3dd   : > { %v942_v51 = vpop.f32.mrb[16].mxu1 }
 0x3de   : > { %v946_v52 = vadd.f32 %v942_v51, %v448_v9  ;;  %v1178_v53 = vpop.f32.mrb[17].mxu1 }
 0x3e0   : > { %948 = vst.msk [vmem:[%s353_s22] sm:$0x1] %vm947_vm3, %v946_v52 }
 0x3e1   : > { %1359 = shalt.err (!%p1356_p11)
}
 0x3e2   : > { %s1360_s27 = scalar_lea.hbm %s1666_s15, 16  ;;  %s1364_s14 = scalar_lea.hbm %s1717_s9, 32 }
 0x3e3   : > { %p1361_p13 = scmp.ne.s32.totalorder %s1666_s15, %s1360_s27  ;;  %p1365_p6 = scmp.lt.u32.totalorder %s1666_s15, %s1717_s9 }
 0x3e4   : > { %p1366_p9 = scmp.lt.u32.totalorder %s1364_s14, %s1360_s27  ;;  %p1368_p10 = scmp.lt.u32.totalorder %s1360_s27, %s1666_s15 }
 0x3e5   : > { %p1362_p0 = pnand %p1361_p13, %p1736_p1 }
 0x3e6   : > { %p1367_p12 = por %p1366_p9, %p1365_p6 }
 0x3e7   : > { %p1363_p5 = pneg %p1362_p0 }
 0x3e8   : > { %p1369_p2 = por %p1368_p10, %p1367_p12 }
 0x3ea   : > { %p1370_p3 = pnand %p1369_p2, %p1363_p5 }
 0x3ec   : > { %1373 = shalt.err (!%p1370_p3)
}
 0x3ed   : > { %1202 = dma.vmem_to_hbm [thread:$0]  (%p1736_p1), %s1668_s25, 16, %s1666_s15, %s950_s18  }
 0x3ee PF: > { %p1219_p4 = scmp.ge.s32.totalorder %s1416_s12, 2  ;;  %s974_s22 = sand.u32 1, %s1404_s30  }
 0x3ef   : > { %p1737_p7 = scmp.ne.s32.totalorder %s1728_s20, 0  ;;  %s975_s23 = scalar_lea.sflag [#allocation4], %s974_s22 }
 0x3f1   : > { %p1212_p8 = pnand %p1219_p4, %p1737_p7 }
 0x3f3   : > { %1399 = dma.done.wait (!%p1212_p8), %s975_s23, 16  }
 0x3f4   : > { %1401 = vsyncadd (!%p1212_p8), %s975_s23, 4294967280  ;;  %s1738_s12 = sld [smem:[#allocation12_spill]]  ;;  %s1739_s11 = sld [smem:[#allocation11_spill]] }
 0x3f5   : > { %s1740_s24 = sld [smem:[#allocation13_spill]]  ;;  %s1741_s30 = smov %s1408_s10 }
 0x3fa   : > { %p21_p11 = scmp.ge.s32.totalorder %s1738_s12, 4   ;;  %s1742_s10 = smov %s1739_s11 }
 0x3fb   : > { %s1743_s11 = smov %s1740_s24 }
 0x3fc   :  { %23 = sbr.rel (!%p21_p11) target bundleno = 5 (0x5), region = 100 }
 0x403   :  { %979 = vsyncpa [#allocation3], 1 }
 0x404   :  { %981 = vsyncpa [#allocation3 + $0x1], 1 }
 0x405   :  { %982 = vsyncpa [#allocation6], 1 }
 0x406   :  { %983 = vsyncpa [#allocation4], 1 }
 0x407   :  { %985 = vsyncpa [#allocation4 + $0x1], 1 }

</bundles_post_ra>
